<compile_context>
chip_gen: v6e
topology: v6e:2x2x1
jax: 0.10.0
libtpu: 0.0.40
codegen_flags: <defaults>
</compile_context>

<pallas_src>
import numpy as np
import jax
import jax.numpy as jnp
from jax.experimental import pallas as pl
from jax.experimental.pallas import tpu as pltpu

_LANE = 128
_TARGET_X_TILE_BYTES = 4 * 1024 * 1024     # per x/out block; 2-4 MiB ~ roofline on v5e/v6e, low overhead on v7x
_VMEM_LIMIT_BYTES = 48 * 1024 * 1024       # 2 bufs * (x + out + pos) tiles fits comfortably; <= v7x 64 MiB physical


def make_sinusoid_table(n_position: int, d_hid: int) -> jnp.ndarray:
    """Deterministic sinusoid encoding table, identical to the PyTorch module."""
    hid = np.arange(d_hid)
    denom = np.power(10000.0, 2.0 * ((hid // 2) / d_hid))       # matches hid_j // 2 / d_hid
    pos = np.arange(n_position)[:, None].astype(np.float64)     # (n_position, 1)
    table = pos / denom[None, :]                                 # (n_position, d_hid)
    table[:, 0::2] = np.sin(table[:, 0::2])
    table[:, 1::2] = np.cos(table[:, 1::2])
    return jnp.asarray(table[None, :, :], dtype=jnp.float32)     # (1, n_position, d_hid)


def _pos_enc_kernel(x_ref, pos_ref, o_ref):
    # x_ref/o_ref: (B, tile_rows, 128); pos_ref: (1, tile_rows, 128) -> broadcasts over batch.
    o_ref[...] = (x_ref[...] + pos_ref[...]).astype(o_ref.dtype)


def _choose_tile_rows(rows: int, bytes_per_row: int) -> int:
    """Rows per block: multiple of 8 (or the full extent) targeting ~4 MiB x tiles."""
    if rows <= 8:
        return rows                       # full extent (legal: equals the array dim)
    t = max(8, _TARGET_X_TILE_BYTES // max(1, bytes_per_row))
    t = min(t, rows)
    return max(8, (t // 8) * 8)


def positional_encoding(x: jnp.ndarray, pos_table: jnp.ndarray, *, donate_x: bool = False) -> jnp.ndarray:
    """x: (B, S, D); pos_table: (1, n_position, D). Returns x + pos_table[:, :S] with dtype x.dtype."""
    B, S, D = x.shape
    n_pos = pos_table.shape[1]
    assert n_pos >= S, "pos_table has fewer positions than the sequence length"

    # Cast the table once in the wrapper (halves table DMA for bf16 x; avoids mixed-dtype VALU work).
    if pos_table.dtype != x.dtype:
        pos_table = pos_table.astype(x.dtype)

    itemsize = jnp.dtype(x.dtype).itemsize
    flat = S * D
    rows = pl.cdiv(flat, _LANE)
    pad = rows * _LANE - flat

    # Lane-dense view of x: (B, rows, 128). Pad the flattened tail if needed so
    # every store is a full unmasked 128-lane vst (cheap one-off copy vs masked
    # stores on every tile).
    x2 = x.reshape(B, flat)
    if pad:
        x2 = jnp.pad(x2, ((0, 0), (0, pad)))
    x3 = x2.reshape(B, rows, _LANE)

    tile_rows = _choose_tile_rows(rows, B * _LANE * itemsize)

    if pad == 0 and tile_rows % 8 == 0 and (n_pos * D) % _LANE == 0:
        # Contiguous full-table view: its leading S*D elements are exactly
        # pos_table[:, :S] flattened, so no slice/copy pass before the kernel.
        pos3 = pos_table.reshape(1, (n_pos * D) // _LANE, _LANE)
    else:
        pos2 = pos_table[:, :S, :].reshape(1, flat)               # tiny (S*D) slice copy
        if pad:
            pos2 = jnp.pad(pos2, ((0, 0), (0, pad)))
        pos3 = pos2.reshape(1, rows, _LANE)

    grid = (pl.cdiv(rows, tile_rows),)
    out3 = pl.pallas_call(
        _pos_enc_kernel,
        out_shape=jax.ShapeDtypeStruct((B, rows, _LANE), x.dtype),
        grid_spec=pltpu.PrefetchScalarGridSpec(
            num_scalar_prefetch=0,
            grid=grid,
            in_specs=[
                pl.BlockSpec((B, tile_rows, _LANE), lambda s: (0, s, 0)),   # x tile (batch folded in)
                pl.BlockSpec((1, tile_rows, _LANE), lambda s: (0, s, 0)),   # pos tile (broadcast in-kernel)
            ],
            out_specs=pl.BlockSpec((B, tile_rows, _LANE), lambda s: (0, s, 0)),
        ),
        compiler_params=pltpu.CompilerParams(
            dimension_semantics=("parallel",),        # lets v7x's 2 TCs shard row tiles; free on v5e/v6e
            vmem_limit_bytes=_VMEM_LIMIT_BYTES,
        ),
        input_output_aliases=({0: 0} if donate_x else {}),
    )(x3, pos3)

    out = out3.reshape(B, rows * _LANE)
    if pad:
        out = out[:, :flat]
    return out.reshape(B, S, D)


if __name__ == "__main__":
    B, S, D = 2, 8, 32
    N_POSITION = 200

    key = jax.random.PRNGKey(0)
    x = jax.random.normal(key, (B, S, D), dtype=jnp.float32)
    pos_table = make_sinusoid_table(N_POSITION, D)

    out = positional_encoding(x, pos_table)
    out = jax.block_until_ready(out)

    # sanity check against pure-JAX reference
    ref = x + pos_table[:, :S, :]
    assert out.shape == (B, S, D)
    assert jnp.allclose(out, ref, atol=1e-6, rtol=1e-6), "mismatch vs reference"

    print("KERNEL_OK")
</pallas_src>

<mosaic_0001>
module attributes {stable_mosaic.version = 11 : i64} {
  func.func @_pos_enc_kernel(%arg0: i32, %arg1: memref<2x2x128xf32, #tpu.memory_space<vmem>>, %arg2: memref<1x2x128xf32, #tpu.memory_space<vmem>>, %arg3: memref<2x2x128xf32, #tpu.memory_space<vmem>>) attributes {dimension_semantics = [#tpu.dimension_semantics<parallel>], iteration_bounds = array<i64: 1>, scalar_prefetch = 0 : i64, scratch_operands = 0 : i64, tpu.core_type = #tpu.core_type<tc>, window_params = [{transform_indices = @transform_0, window_bounds = array<i64: 2, 2, 128>}, {transform_indices = @transform_1, window_bounds = array<i64: 1, 2, 128>}, {transform_indices = @transform_2, window_bounds = array<i64: 2, 2, 128>}]} {
    %c0 = arith.constant 0 : index
    %c0_0 = arith.constant 0 : index
    %c0_1 = arith.constant 0 : index
    %0 = vector.load %arg1[%c0, %c0_0, %c0_1] : memref<2x2x128xf32, #tpu.memory_space<vmem>>, vector<2x2x128xf32>
    %c0_2 = arith.constant 0 : index
    %c0_3 = arith.constant 0 : index
    %c0_4 = arith.constant 0 : index
    %1 = vector.load %arg2[%c0_2, %c0_3, %c0_4] : memref<1x2x128xf32, #tpu.memory_space<vmem>>, vector<1x2x128xf32>
    %2 = vector.broadcast %1 : vector<1x2x128xf32> to vector<2x2x128xf32>
    %3 = arith.addf %0, %2 : vector<2x2x128xf32>
    %c0_5 = arith.constant 0 : index
    %c0_6 = arith.constant 0 : index
    %c0_7 = arith.constant 0 : index
    %4 = vector.load %arg3[%c0_5, %c0_6, %c0_7] : memref<2x2x128xf32, #tpu.memory_space<vmem>>, vector<2x2x128xf32>
    tpu.vector_store %arg3[%c0_5, %c0_6, %c0_7], %3 {strides = array<i32>} : memref<2x2x128xf32, #tpu.memory_space<vmem>>, vector<2x2x128xf32>,
    return
  }
  func.func @transform_0(%arg0: i32) -> (i32, i32, i32) {
    %c0_i32 = arith.constant 0 : i32
    %c0_i32_0 = arith.constant 0 : i32
    %c0_i32_1 = arith.constant 0 : i32
    return %c0_i32, %arg0, %c0_i32_0 : i32, i32, i32
  }
  func.func @transform_1(%arg0: i32) -> (i32, i32, i32) {
    %c0_i32 = arith.constant 0 : i32
    %c0_i32_0 = arith.constant 0 : i32
    %c0_i32_1 = arith.constant 0 : i32
    return %c0_i32, %arg0, %c0_i32_0 : i32, i32, i32
  }
  func.func @transform_2(%arg0: i32) -> (i32, i32, i32) {
    %c0_i32 = arith.constant 0 : i32
    %c0_i32_0 = arith.constant 0 : i32
    %c0_i32_1 = arith.constant 0 : i32
    return %c0_i32, %arg0, %c0_i32_0 : i32, i32, i32
  }
}

</mosaic_0001>

<bundles_post_ra>
// kernel: tpu_custom_call.1
= control target key start
LH: loop header
LB: loop body
LE: loop exit
PB: predicated region body
PF: predicated region fallthrough
CT: control target
= control target key end

     0   :  { %7 = vsyncpa [#allocation3], 0  ;;  %s169_s0 = inlined_call_operand.hbm [shape: f32[2,2,128], index: 0, kind: input, shape index: {}]   ;;  %s170_s1 = inlined_call_operand.hbm [shape: f32[1,2,128], index: 1, kind: input, shape index: {}]   ;;  %s171_s2 = inlined_call_operand.hbm [shape: f32[2,2,128], index: 2, kind: output, shape index: {}]  }
   0x1   :  { %8 = vsyncpa [#allocation6], 0 }
   0x2   :  { %9 = vsyncpa [#allocation4], 0  ;;  %s134_s9 = smov [#allocation2]  }
   0x3   :  { %s15_s10 = sshll.u32 %s134_s9, 4  ;;  %s16_s10 = int_to_ptr.vmem [resolvable:$true] %s15_s10 }
   0x4   :  { %s76_s11 = scalar_lea.vmem %s16_s10, 64  ;;  %p81_p1 = scmp.lt.s32.totalorder %s16_s10, %s16_s10 }
   0x5   :  { %p77_p0 = scmp.ne.s32.totalorder %s16_s10, %s76_s11  ;;  %p82_p2 = scmp.lt.s32.totalorder %s76_s11, %s76_s11 }
   0x7   :  { %p83_p3 = por %p82_p2, %p81_p1 }
   0x9   :  { %p84_p4 = pnand %p83_p3, %p77_p0 }
   0xb   :  { %87 = shalt.err (!%p84_p4)
}
   0xc   :  { %s135_s12 = smov 32   ;;  %s136_s13 = smov 2  }
   0xd   :  { %21 = dma.hbm_to_vmem [thread:$0]  %s169_s0, 64, %s16_s10, [#allocation3], %s135_s12, %s135_s12, %s136_s13  }
   0xe   :  { %s137_s16 = smov [#allocation5]  }
   0xf   :  { %s28_s17 = sshll.u32 %s137_s16, 4  ;;  %s29_s17 = int_to_ptr.vmem [resolvable:$true] %s28_s17 }
  0x10   :  { %s96_s18 = scalar_lea.vmem %s29_s17, 32  ;;  %p101_p6 = scmp.lt.s32.totalorder %s29_s17, %s29_s17 }
  0x11   :  { %p97_p5 = scmp.ne.s32.totalorder %s29_s17, %s96_s18  ;;  %p102_p7 = scmp.lt.s32.totalorder %s96_s18, %s96_s18 }
  0x13   :  { %p103_p8 = por %p102_p7, %p101_p6 }
  0x15   :  { %p104_p9 = pnand %p103_p8, %p97_p5 }
  0x17   :  { %107 = shalt.err (!%p104_p9)
}
  0x18   :  { %31 = dma.hbm_to_vmem [thread:$0]  %s170_s1, 32, %s29_s17, [#allocation6]  }
  0x19   :  { %128 = dma.done.wait [#allocation3], 64  }
  0x1a   :  { %129 = vsyncadd [#allocation3], 4294967232 }
  0x1b   :  { %130 = dma.done.wait [#allocation6], 32  }
  0x1c   :  { %131 = vsyncadd [#allocation6], 4294967264  ;;  %s138_s21 = smov [#allocation7]   ;;  %v38_v0 = vld [vmem:[#allocation2] sm:$0x3] }
  0x1d   :  { %s50_s0 = sshll.u32 %s138_s21, 4  ;;  %v40_v1 = vld [vmem:[#allocation5] sm:$0x3]  ;;  %v39_v2 = vld [vmem:[#allocation2 + $0x2] sm:$0x3]  ;;  %s51_s0 = int_to_ptr.vmem [resolvable:$true] %s50_s0 }
  0x1e   :  { %v41_v3 = vadd.f32 %v40_v1, %v38_v0  ;;  %v42_v4 = vadd.f32 %v40_v1, %v39_v2  ;;  %s108_s22 = scalar_lea.vmem %s51_s0, 64  ;;  %p113_p11 = scmp.lt.s32.totalorder %s51_s0, %s51_s0 }
  0x1f   :  { %p109_p10 = scmp.ne.s32.totalorder %s51_s0, %s108_s22  ;;  %p114_p12 = scmp.lt.s32.totalorder %s108_s22, %s108_s22 }
  0x20   :  { %43 = vst [vmem:[#allocation7] sm:$0x3] %v41_v3  ;;  %44 = vst [vmem:[#allocation7 + $0x2] sm:$0x3] %v42_v4 }
  0x21   :  { %p115_p13 = por %p114_p12, %p113_p11 }
  0x23   :  { %p116_p0 = pnand %p115_p13, %p109_p10 }
  0x25   :  { %119 = shalt.err (!%p116_p0)
}
  0x26   :  { %56 = dma.vmem_to_hbm [thread:$0]  %s51_s0, 64, %s171_s2, [#allocation4], %s135_s12, %s135_s12, %s136_s13  }
  0x27   :  { %132 = dma.done.wait [#allocation4], 64  }
  0x28   :  { %133 = vsyncadd [#allocation4], 4294967232 }
  0x29   :  { %60 = vsyncpa [#allocation3], 1 }
  0x2a   :  { %61 = vsyncpa [#allocation6], 1 }
  0x2b   :  { %62 = vsyncpa [#allocation4], 1 }

</bundles_post_ra>
